<compile_context>
chip_gen: v5e
topology: v5e:2x2
jax: 0.10.0
libtpu: 0.0.40
codegen_flags: <defaults>
</compile_context>

<pallas_src>
import functools
import math

import jax
import jax.numpy as jnp
from jax.experimental import pallas as pl
from jax.experimental.pallas import tpu as pltpu

LANE = 128


def _round_up(x, m):
    return ((x + m - 1) // m) * m


def _hw_budgets():
    """(input-block byte target, vmem_limit cap) tuned per TPU generation."""
    try:
        vmem_cap = int(pltpu.get_tpu_info().vmem_capacity_bytes)
    except Exception:
        vmem_cap = 64 << 20          # conservative default (v7x-sized VMEM)
    if vmem_cap <= (64 << 20):       # v7x: 64 MiB physical VMEM per TC
        return 8 << 20, 48 << 20
    return 12 << 20, 96 << 20        # v5e / v6e: 128 MiB VMEM


def _sum_mid_kernel(x_ref, o_ref, acc_ref, *, c_total, ck):
    """Reduce the middle (C) axis of (tp, ck, pt) blocks into an f32 accumulator."""
    k = pl.program_id(2)

    @pl.when(k == 0)
    def _():
        acc_ref[...] = jnp.zeros_like(acc_ref)

    x = x_ref[...]
    if c_total % ck:  # ragged last C chunk: zero the out-of-bounds tail
        cidx = jax.lax.broadcasted_iota(jnp.int32, x.shape, 1)
        x = jnp.where(k * ck + cidx < c_total, x, jnp.zeros_like(x))
    acc_ref[...] += jnp.sum(x, axis=1, dtype=jnp.float32)

    @pl.when(k == pl.num_programs(2) - 1)
    def _():
        o_ref[...] = acc_ref[...].astype(o_ref.dtype)


def _sum_last_kernel(x_ref, o_ref, acc_ref, *, c_total, ck):
    """Reduce the last (lane) axis of (tp, ck) blocks into an f32 accumulator."""
    k = pl.program_id(1)

    @pl.when(k == 0)
    def _():
        acc_ref[...] = jnp.zeros_like(acc_ref)

    x = x_ref[...]
    if c_total % ck:
        cidx = jax.lax.broadcasted_iota(jnp.int32, x.shape, 1)
        x = jnp.where(k * ck + cidx < c_total, x, jnp.zeros_like(x))
    acc_ref[...] += jnp.sum(x, axis=1, keepdims=True, dtype=jnp.float32)

    @pl.when(k == pl.num_programs(1) - 1)
    def _():
        o_ref[...] = acc_ref[...].astype(o_ref.dtype)


def pallas_sum(x, dim, keep_dim=False):
    """Equivalent of torch `input.sum(dim, keepdim=keep_dim)` for float inputs."""
    # TODO(synk): torch promotes bool/int inputs to int64 for sum(); only float
    # dtypes are handled here (output dtype == input dtype, f32 accumulation).
    dim = dim % x.ndim
    shape = x.shape
    pre = int(math.prod(shape[:dim]))
    C = int(shape[dim])
    post = int(math.prod(shape[dim + 1:]))

    itemsize = jnp.dtype(x.dtype).itemsize
    sub = max(8, 32 // itemsize)          # sublane granularity for this dtype
    target_bytes, vmem_cap_limit = _hw_budgets()

    if post == 1:
        # ---- last-dim reduction: (pre, C) with C on the lane axis -----------
        xv = x.reshape(pre, C)
        tp = pre if pre < sub else sub
        ck_budget = max(LANE, (target_bytes // max(1, tp * itemsize)) // LANE * LANE)
        ck = C if C <= ck_budget else ck_budget
        if pre > sub:
            tp_budget = max(sub, (target_bytes // max(1, ck * itemsize)) // sub * sub)
            tp = min(tp_budget, (pre // sub) * sub)
        # v7x has two TensorCores: keep >=2 parallel grid steps when possible.
        if pl.cdiv(pre, tp) == 1 and pre >= 2 * sub:
            tp = _round_up(pl.cdiv(pre, 2), sub)

        grid = (pl.cdiv(pre, tp), pl.cdiv(C, ck))
        needed = 2 * (tp * ck * itemsize + tp * itemsize) + tp * 4
        vmem_limit = int(min(vmem_cap_limit, max(32 << 20, needed + (4 << 20))))

        out = pl.pallas_call(
            functools.partial(_sum_last_kernel, c_total=C, ck=ck),
            out_shape=jax.ShapeDtypeStruct((pre, 1), x.dtype),
            grid_spec=pltpu.PrefetchScalarGridSpec(
                num_scalar_prefetch=0,
                grid=grid,
                in_specs=[pl.BlockSpec((tp, ck), lambda i, k: (i, k))],
                out_specs=pl.BlockSpec((tp, 1), lambda i, k: (i, 0)),
                scratch_shapes=[pltpu.VMEM((tp, 1), jnp.float32)],
            ),
            compiler_params=pltpu.CompilerParams(
                dimension_semantics=("parallel", "arbitrary"),
                vmem_limit_bytes=vmem_limit,
            ),
        )(xv)
    else:
        # ---- general case: reduce the middle axis of (pre, C, post) ---------
        xv = x.reshape(pre, C, post)
        tp = pre if pre < sub else sub
        ck_min = C if C <= sub else sub
        # Lane tile first (DMA contiguity), then C chunk, then extra rows.
        pt_budget = max(
            LANE, (target_bytes // max(1, tp * ck_min * itemsize)) // LANE * LANE)
        pt = post if post <= pt_budget else pt_budget
        ck_budget = max(sub, (target_bytes // max(1, tp * pt * itemsize)) // sub * sub)
        ck = C if C <= ck_budget else ck_budget
        if pre > sub:
            tp_budget = max(sub, (target_bytes // max(1, ck * pt * itemsize)) // sub * sub)
            tp = min(tp_budget, (pre // sub) * sub)
        # v7x has two TensorCores: keep >=2 parallel grid steps when possible.
        if pl.cdiv(pre, tp) * pl.cdiv(post, pt) == 1:
            if post >= 2 * LANE:
                pt = _round_up(pl.cdiv(post, 2), LANE)
            elif pre >= 2 * sub:
                tp = _round_up(pl.cdiv(pre, 2), sub)

        grid = (pl.cdiv(pre, tp), pl.cdiv(post, pt), pl.cdiv(C, ck))
        needed = 2 * (tp * ck * pt * itemsize + tp * pt * itemsize) + tp * pt * 4
        vmem_limit = int(min(vmem_cap_limit, max(32 << 20, needed + (4 << 20))))

        out = pl.pallas_call(
            functools.partial(_sum_mid_kernel, c_total=C, ck=ck),
            out_shape=jax.ShapeDtypeStruct((pre, post), x.dtype),
            grid_spec=pltpu.PrefetchScalarGridSpec(
                num_scalar_prefetch=0,
                grid=grid,
                in_specs=[pl.BlockSpec((tp, ck, pt), lambda i, j, k: (i, k, j))],
                out_specs=pl.BlockSpec((tp, pt), lambda i, j, k: (i, j)),
                scratch_shapes=[pltpu.VMEM((tp, pt), jnp.float32)],
            ),
            compiler_params=pltpu.CompilerParams(
                dimension_semantics=("parallel", "parallel", "arbitrary"),
                vmem_limit_bytes=vmem_limit,
            ),
        )(xv)

    if keep_dim:
        new_shape = shape[:dim] + (1,) + shape[dim + 1:]
    else:
        new_shape = shape[:dim] + shape[dim + 1:]
    return out.reshape(new_shape)


if __name__ == "__main__":
    key = jax.random.PRNGKey(0)
    # Small NCHW input (batch=2, channels=4, spatial=16x16).
    x = jax.random.normal(key, (2, 4, 16, 16), dtype=jnp.float32)

    # Sum over channel dim, keep_dim=False (module: Sum(dim=1)).
    y = jax.block_until_ready(pallas_sum(x, dim=1, keep_dim=False))
    y_ref = jnp.sum(x, axis=1)
    assert y.shape == y_ref.shape and y.dtype == x.dtype
    assert jnp.allclose(y, y_ref, atol=1e-5, rtol=1e-5)

    # Sum over a spatial dim with keep_dim=True (module: Sum(dim=2, keep_dim=True)).
    y2 = jax.block_until_ready(pallas_sum(x, dim=2, keep_dim=True))
    y2_ref = jnp.sum(x, axis=2, keepdims=True)
    assert y2.shape == y2_ref.shape and y2.dtype == x.dtype
    assert jnp.allclose(y2, y2_ref, atol=1e-5, rtol=1e-5)

    # Sum over the last dim (exercises the dedicated lane-reduction path).
    y3 = jax.block_until_ready(pallas_sum(x, dim=-1, keep_dim=False))
    y3_ref = jnp.sum(x, axis=-1)
    assert y3.shape == y3_ref.shape and y3.dtype == x.dtype
    assert jnp.allclose(y3, y3_ref, atol=1e-5, rtol=1e-5)

    print("KERNEL_OK")
</pallas_src>

<mosaic_0001>
module attributes {stable_mosaic.version = 11 : i64} {
  func.func @_sum_mid_kernel(%arg0: i32, %arg1: i32, %arg2: i32, %arg3: memref<2x4x128xf32, #tpu.memory_space<vmem>>, %arg4: memref<2x128xf32, #tpu.memory_space<vmem>>, %arg5: memref<2x128xf32, #tpu.memory_space<vmem>>) attributes {dimension_semantics = [#tpu.dimension_semantics<parallel>, #tpu.dimension_semantics<parallel>, #tpu.dimension_semantics<arbitrary>], iteration_bounds = array<i64: 1, 2, 1>, scalar_prefetch = 0 : i64, scratch_operands = 1 : i64, tpu.core_type = #tpu.core_type<tc>, window_params = [{transform_indices = @transform_0, window_bounds = array<i64: 2, 4, 128>}, {transform_indices = @transform_1, window_bounds = array<i64: 2, 128>}]} {
    %c0_i32 = arith.constant 0 : i32
    %0 = arith.cmpi eq, %arg2, %c0_i32 : i32
    %1 = arith.extui %0 : i1 to i32
    %c0_i32_0 = arith.constant 0 : i32
    %2 = arith.cmpi ne, %1, %c0_i32_0 : i32
    scf.if %2 {
      %cst_9 = arith.constant 0.000000e+00 : f32
      %11 = vector.broadcast %cst_9 : f32 to vector<2x128xf32>
      %c0_10 = arith.constant 0 : index
      %c0_11 = arith.constant 0 : index
      %12 = vector.load %arg5[%c0_10, %c0_11] : memref<2x128xf32, #tpu.memory_space<vmem>>, vector<2x128xf32>
      tpu.vector_store %arg5[%c0_10, %c0_11], %11 {strides = array<i32>} : memref<2x128xf32, #tpu.memory_space<vmem>>, vector<2x128xf32>,
    } else {
    }
    %c0 = arith.constant 0 : index
    %c0_1 = arith.constant 0 : index
    %c0_2 = arith.constant 0 : index
    %3 = vector.load %arg3[%c0, %c0_1, %c0_2] : memref<2x4x128xf32, #tpu.memory_space<vmem>>, vector<2x4x128xf32>
    %c0_3 = arith.constant 0 : index
    %c0_4 = arith.constant 0 : index
    %4 = vector.load %arg5[%c0_3, %c0_4] : memref<2x128xf32, #tpu.memory_space<vmem>>, vector<2x128xf32>
    %cst = arith.constant dense<0.000000e+00> : vector<2x128xf32>
    %5 = vector.multi_reduction <add>, %3, %cst [1] : vector<2x4x128xf32> to vector<2x128xf32>
    %6 = arith.addf %4, %5 : vector<2x128xf32>
    %c0_5 = arith.constant 0 : index
    %c0_6 = arith.constant 0 : index
    %7 = vector.load %arg5[%c0_5, %c0_6] : memref<2x128xf32, #tpu.memory_space<vmem>>, vector<2x128xf32>
    tpu.vector_store %arg5[%c0_5, %c0_6], %6 {strides = array<i32>} : memref<2x128xf32, #tpu.memory_space<vmem>>, vector<2x128xf32>,
    %c0_i32_7 = arith.constant 0 : i32
    %8 = arith.cmpi eq, %arg2, %c0_i32_7 : i32
    %9 = arith.extui %8 : i1 to i32
    %c0_i32_8 = arith.constant 0 : i32
    %10 = arith.cmpi ne, %9, %c0_i32_8 : i32
    scf.if %10 {
      %c0_9 = arith.constant 0 : index
      %c0_10 = arith.constant 0 : index
      %11 = vector.load %arg5[%c0_9, %c0_10] : memref<2x128xf32, #tpu.memory_space<vmem>>, vector<2x128xf32>
      %c0_11 = arith.constant 0 : index
      %c0_12 = arith.constant 0 : index
      %12 = vector.load %arg4[%c0_11, %c0_12] : memref<2x128xf32, #tpu.memory_space<vmem>>, vector<2x128xf32>
      tpu.vector_store %arg4[%c0_11, %c0_12], %11 {strides = array<i32>} : memref<2x128xf32, #tpu.memory_space<vmem>>, vector<2x128xf32>,
    } else {
    }
    return
  }
  func.func @transform_0(%arg0: i32, %arg1: i32, %arg2: i32) -> (i32, i32, i32) {
    %c0_i32 = arith.constant 0 : i32
    return %arg0, %arg2, %arg1 : i32, i32, i32
  }
  func.func @transform_1(%arg0: i32, %arg1: i32, %arg2: i32) -> (i32, i32) {
    %c0_i32 = arith.constant 0 : i32
    return %arg0, %arg1 : i32, i32
  }
}

</mosaic_0001>

<bundles_post_ra>
// kernel: tpu_custom_call.1
= control target key start
LH: loop header
LB: loop body
LE: loop exit
PB: predicated region body
PF: predicated region fallthrough
CT: control target
= control target key end

     0   :  { %6 = vsyncpa [#allocation4], 0  ;;  %s635_s0 = inlined_call_operand.hbm [shape: f32[2,4,256], index: 0, kind: input, shape index: {}]   ;;  %s636_s1 = inlined_call_operand.hbm [shape: f32[2,256], index: 1, kind: output, shape index: {}]  }
   0x1   :  { %8 = vsyncpa [#allocation4 + $0x1], 0 }
   0x2   :  { %9 = vsyncpa [#allocation5], 0 }
   0x3   :  { %11 = vsyncpa [#allocation5 + $0x1], 0  ;;  %s514_s6 = smov 0   ;;  %s516_s7 = smov 0  }
   0x4   :  { %s518_s8 = smov 0   ;;  %s520_s9 = smov 0  }
   0x5   :  { %s522_s10 = smov 0   ;;  %s524_s11 = smov 0  }
   0x6 LB: > { %s307_s12 = sadd.s32 4294967295, %s498_s11   ;;  %s308_s13 = sadd.s32 4294967294, %s498_s11   ;;  %s498_s11 = sphi %s524_s11, %s17_s11   ;;  %s494_s10 = sphi %s522_s10, %s645_s10   ;;  %s490_s9 = sphi %s520_s9, %s644_s9   ;;  %s486_s8 = sphi %s518_s8, %s643_s8   ;;  %s482_s7 = sphi %s516_s7, %s642_s7   ;;  %s478_s6 = sphi %s514_s6, %s641_s6  }
   0x7   : > { %s32_s14 = sadd.s32 1, %s494_s10  ;;  %s47_s15 = sadd.s32 1, %s486_s8 }
   0x8   : > { %p34_p0 = scmp.ge.s32.totalorder %s32_s14, 2  ;;  %p54_p1 = scmp.ne.s32.totalorder %s486_s8, %s482_s7 }
   0x9   : > { %p55_p2 = scmp.eq.s32.totalorder %s498_s11, 0  ;;  %p60_p3 = scmp.ne.s32.totalorder %s482_s7, %s478_s6 }
   0xa   : > { %s647_s14 = smov (%p34_p0, %s32_s14), 0  ;;  %p61_p5 = scmp.eq.s32.totalorder %s307_s12, 0 }
   0xb   : > { %p555_p4 = por %p55_p2, %p54_p1  ;;  %s43_s17 = ssub.s32 %s494_s10, %s647_s14 }
   0xc   : > { %p86_p6 = scmp.eq.s32.totalorder %s307_s12, 1  ;;  %p45_p7 = scmp.eq.s32.totalorder %s43_s17, 0 }
   0xd   : > { %p561_p8 = por %p61_p5, %p60_p3  ;;  %p92_p10 = scmp.eq.s32.totalorder %s308_s13, 1 }
   0xe   : > { %p565_p9 = por %p86_p6, %p54_p1  ;;  %p310_p12 = scmp.ge.s32.totalorder %s498_s11, 2 }
   0xf   : > { %s570_s20 = scalar_select %p45_p7, %s486_s8, %s47_s15  }
  0x10   : > { %p572_p11 = por %p92_p10, %p60_p3  ;;  %p332_p13 = scmp.lt.s32.totalorder %s498_s11, 2 }
  0x11   : > { %s112_s22 = sand.u32 1, %s486_s8   ;;  %s312_s24 = sshll.u32 %s494_s10, 2 }
  0x12   : > { %s311_s23 = sshll.u32 %s112_s22, 3  ;;  %s125_s27 = scalar_lea.hbm %s635_s0, %s312_s24 }
  0x13   : > { %s116_s28 = scalar_lea.vmem [#allocation3], %s311_s23  ;;  %s126_s30 = sshll.u32 %s125_s27, 4  ;;  %s127_s30 = int_to_ptr.hbm [resolvable:$true] %s126_s30 }
  0x14   : > { %s128_s29 = sshll.u32 %s116_s28, 4  ;;  %p325_p0 = pnand %p332_p13, %p555_p4  ;;  %s129_s29 = int_to_ptr.vmem [resolvable:$true] %s128_s29 }
  0x15   : > { %s113_s2 = scalar_lea.sflag [#allocation4], %s112_s22  ;;  %s500_s3 = smov 128  }
  0x16   : > { %s501_s4 = smov 64   ;;  %s502_s5 = smov 4  }
  0x17   : > { %327 = dma.hbm_to_vmem [thread:$0]  (!%p325_p0), %s127_s30, 128, %s129_s29, %s113_s2, %s500_s3, %s501_s4, %s502_s5  }
  0x18   : > { %p313_p1 = scmp.ge.s32.totalorder %s498_s11, 1  ;;  %p136_p2 = scmp.lt.s32.totalorder %s498_s11, 3 }
  0x1a   : > { %p137_p3 = pnand %p313_p1, %p136_p2 }
  0x1b   : > { %s588_s12 = sand.u32 (!%p137_p3), 1, %s482_s7  }
  0x1c   : > { %140 = sbr.rel (%p137_p3) target bundleno = 63 (0x3f), region = 24  ;;  %s314_s13 = sshll.u32 (!%p137_p3), %s588_s12, 3 }
  0x1d   : > { %s143_s15 = scalar_lea.sflag (!%p137_p3), [#allocation4], %s588_s12  ;;  %s146_s17 = scalar_lea.vmem (!%p137_p3), [#allocation3], %s314_s13 }
  0x21   : > { %469 = dma.done.wait (%p561_p8), %s143_s15, 128  }
  0x22   : > { %471 = vsyncadd (%p561_p8), %s143_s15, 4294967168  ;;  %v503_v0 = vmov 0.0   ;;  %vm175_vm0 = vcmask 1043456   ;;  %v172_v1 = vld [vmem:[%s146_s17] sm:$0xf]  ;;  %vm192_vm1 = vcmask 1041409  }
  0x23   : > { %171 = vst [vmem:[#allocation2] sm:$0x3] %v503_v0  ;;  %v173_v2 = vld [vmem:[%s146_s17 + $0x4] sm:$0xf]  ;;  %v176_v3 = vsel %vm175_vm0, %v172_v1, 0.0  ;;  %s315_s16 = sshll.u32 %s588_s12, 1 }
  0x24   : > { %v183_v4 = vsel %vm175_vm0, %v173_v2, 0.0  ;;  %v177_v5 = vrot.slane %v176_v3, 4  ;;  %s317_s18 = sshll.u32 %s490_s9, 1  ;;  %s165_s25 = scalar_lea.vmem [#allocation6], %s315_s16 }
  0x25   : > { %v184_v6 = vrot.slane %v183_v4, 4  ;;  %s215_s24 = scalar_lea.hbm %s636_s1, %s317_s18  ;;  %s217_s26 = sshll.u32 %s165_s25, 4  ;;  %s218_s26 = int_to_ptr.vmem [resolvable:$true] %s217_s26 }
  0x26   : > { %v178_v7 = vadd.f32 %v177_v5, %v176_v3  ;;  %s219_s27 = sshll.u32 %s215_s24, 4  ;;  %s203_s28 = scalar_lea.sflag [#allocation5], %s588_s12  ;;  %s220_s27 = int_to_ptr.hbm [resolvable:$true] %s219_s27 }
  0x27   : > { %v185_v8 = vadd.f32 %v184_v6, %v183_v4  ;;  %s430_s29 = sshra.s32 %s220_s27, 4  ;;  %s436_s3 = scalar_lea.hbm %s636_s1, 4  ;;  %s431_s29 = int_to_ptr.hbm [resolvable:$true] %s430_s29 }
  0x28   : > { %v179_v9 = vrot.slane %v178_v7, 2  ;;  %s432_s30 = scalar_lea.hbm %s431_s29, 2  ;;  %p437_p7 = scmp.lt.s32.totalorder %s431_s29, %s636_s1 }
  0x29   : > { %v186_v10 = vrot.slane %v185_v8, 2  ;;  %p433_p4 = scmp.ne.s32.totalorder %s431_s29, %s432_s30  ;;  %p438_p8 = scmp.lt.s32.totalorder %s436_s3, %s432_s30 }
  0x2a   : > { %v180_v11 = vadd.f32 %v179_v9, %v178_v7  ;;  %v174_v15 = vld [vmem:[#allocation2] sm:$0x3] }
  0x2b   : > { %v187_v12 = vadd.f32 %v186_v10, %v185_v8  ;;  %p434_p5 = pnand %p433_p4, %p565_p9  ;;  %p439_p10 = por %p438_p8, %p437_p7 }
  0x2c   : > { %v181_v13 = vrot.slane %v180_v11, 1 }
  0x2d   : > { %v188_v14 = vrot.slane %v187_v12, 1  ;;  %p435_p6 = pneg %p434_p5 }
  0x2e   : > { %v182_v16 = vadd.f32 %v181_v13, %v180_v11 }
  0x2f   : > { %v189_v17 = vadd.f32 %v188_v14, %v187_v12  ;;  %p440_p13 = pnand %p439_p10, %p435_p6 }
  0x31   : > { %v193_v18 = vsel %vm192_vm1, %v189_v17, %v182_v16 }
  0x32   : > { %v195_v19 = vadd.f32 %v193_v18, %v174_v15 }
  0x34   : > { %196 = vst [vmem:[#allocation2] sm:$0x3] %v195_v19 }
  0x3b   : > { %v200_v20 = vld [vmem:[#allocation2] sm:$0x3] }
  0x3c   : > { %201 = vst [vmem:[%s165_s25] sm:$0x3] %v200_v20 }
  0x3d   : > { %443 = shalt.err (!%p440_p13)
}
  0x3e   : > { %322 = dma.vmem_to_hbm [thread:$0]  (%p565_p9), %s218_s26, 32, %s220_s27, %s203_s28  }
  0x3f PF: > { %s231_s12 = sand.u32 1, %s478_s6   ;;  %p329_p0 = pnand %p310_p12, %p572_p11 }
  0x40   : > { %s232_s13 = scalar_lea.sflag [#allocation5], %s231_s12 }
  0x41   : > { %p330_p1 = pneg %p329_p0 }
  0x43   : > { %473 = dma.done.wait (%p330_p1), %s232_s13, 32  }
  0x44   : > { %475 = vsyncadd (%p330_p1), %s232_s13, 4294967264  ;;  %s17_s11 = sadd.s32 1, %s498_s11   ;;  %s641_s6 = smov %s482_s7 }
  0x45   : > { %p14_p2 = scmp.ge.s32.totalorder %s17_s11, 4   ;;  %s642_s7 = smov %s486_s8 }
  0x46   : > { %s643_s8 = smov %s570_s20  ;;  %s644_s9 = smov %s494_s10 }
  0x47   : > { %s645_s10 = smov %s647_s14  ;;  %16 = sbr.rel (!%p14_p2) target bundleno = 6 (0x6), region = 77 }
  0x4c   :  { %238 = vsyncpa [#allocation4], 1 }
  0x4d   :  { %240 = vsyncpa [#allocation4 + $0x1], 1 }
  0x4e   :  { %241 = vsyncpa [#allocation5], 1 }
  0x4f   :  { %243 = vsyncpa [#allocation5 + $0x1], 1 }

</bundles_post_ra>
